<compile_context>
chip_gen: v5e
topology: v5e:2x2
jax: 0.10.0
libtpu: 0.0.40
codegen_flags: <defaults>
</compile_context>

<pallas_src>
import jax
import jax.numpy as jnp
from jax.experimental import pallas as pl
from jax.experimental.pallas import tpu as pltpu


def _round_up(x, m):
    return ((x + m - 1) // m) * m


def _make_disc_kernel(n_pos, n_total, tile_n):
    """Kernel body closed over static sizes (N, 2N, TILE_N)."""

    def kernel(v_ref, bc_ref, h_ref, logits_ref, bce_ref):
        bc = bc_ref[0, 0]  # scalar b.c from SMEM

        # (1, TILE_N) <- contract (1, D) with (TILE_N, D) over D.
        # This is the q @ k.T contraction pattern: MXU matmul with a
        # lane-dense (1, TILE_N) result -- no column-shaped stores.
        s = jax.lax.dot_general(
            v_ref[...], h_ref[...],
            dimension_numbers=(((1,), (1,)), ((), ())),
            preferred_element_type=jnp.float32,
        ) + bc
        logits_ref[...] = s

        # Global column index of each logit in the flattened (2N,) output.
        col = pl.program_id(0) * tile_n + jax.lax.broadcasted_iota(
            jnp.int32, (1, tile_n), 1)
        lbl = jnp.where(col < n_pos, 1.0, 0.0)   # 1 for h_pl rows, 0 for h_mi
        valid = col < n_total                    # mask row padding

        # Numerically stable BCE-with-logits (per-element terms).
        bce = jnp.maximum(s, 0.0) - s * lbl + jnp.log1p(jnp.exp(-jnp.abs(s)))
        bce_ref[...] = jnp.where(valid, bce, 0.0)

    return kernel


def discriminator_forward(c, h_pl, h_mi, W, b, *, tile_n=512, stream_dtype=None):
    """Discriminator.forward + DGI.loss_compute (BCE-with-logits).

    Returns (logits[2N] f32, loss scalar f32).

    stream_dtype: dtype used to stream the stacked embeddings through HBM
      (e.g. jnp.bfloat16 halves HBM traffic on the memory-bound path).
      Accumulation / BCE math stays in f32.
    """
    N, D = h_pl.shape
    n_total = 2 * N
    sdt = jnp.float32 if stream_dtype is None else stream_dtype
    align = 16 if sdt == jnp.bfloat16 else 8

    # Algebraic collapse GEMM -> GEMV (done once in the wrapper, O(D^2)):
    #   (h @ W.T + b) . c  ==  h @ (W.T @ c) + b . c
    c32 = c.astype(jnp.float32)
    v = (W.astype(jnp.float32).T @ c32).reshape(1, D).astype(sdt)   # (1, D)
    bc = jnp.dot(b.astype(jnp.float32), c32).reshape(1, 1)          # (1, 1)

    # Single stacked input -> one double-buffered input pipeline.
    hcat = jnp.concatenate([h_pl, h_mi], axis=0).astype(sdt)        # (2N, D)

    # Row tiling: lane-dense output blocks (multiple of 128 lanes when the
    # grid has more than one step), sublane-aligned row tiles.
    if n_total <= tile_n:
        tile = _round_up(n_total, align)
    else:
        tile = _round_up(tile_n, 128)
    padded = _round_up(n_total, tile)
    if padded != n_total:
        hcat = jnp.pad(hcat, ((0, padded - n_total), (0, 0)))
    grid = (padded // tile,)

    itemsize = jnp.dtype(sdt).itemsize
    cost = pl.CostEstimate(
        flops=int(2 * padded * D),
        transcendentals=int(2 * padded),
        bytes_accessed=int(padded * D * itemsize + D * itemsize + 2 * padded * 4),
    )

    logits_row, bce_row = pl.pallas_call(
        _make_disc_kernel(N, n_total, tile),
        grid=grid,
        in_specs=[
            pl.BlockSpec((1, D), lambda i: (0, 0)),                   # v (resident)
            pl.BlockSpec(memory_space=pltpu.MemorySpace.SMEM),        # bc scalar
            pl.BlockSpec((tile, D), lambda i: (i, 0)),                # h row tile
        ],
        out_specs=(
            pl.BlockSpec((1, tile), lambda i: (0, i)),                # logits slab
            pl.BlockSpec((1, tile), lambda i: (0, i)),                # bce slab
        ),
        out_shape=(
            jax.ShapeDtypeStruct((1, padded), jnp.float32),
            jax.ShapeDtypeStruct((1, padded), jnp.float32),
        ),
        compiler_params=pltpu.CompilerParams(
            dimension_semantics=("parallel",),
            vmem_limit_bytes=32 * 1024 * 1024,
        ),
        cost_estimate=cost,
    )(v, bc, hcat)

    logits = logits_row[0, :n_total]                 # [sc_1 ; sc_2]
    loss = jnp.sum(bce_row) / float(n_total)         # mean BCE over 2N logits
    return logits, loss


def _reference(c, h_pl, h_mi, W, b):
    proj = lambda h: h @ W.T + b
    sc1 = jnp.sum(proj(h_pl) * c[None, :], axis=-1)
    sc2 = jnp.sum(proj(h_mi) * c[None, :], axis=-1)
    logits = jnp.concatenate([sc1, sc2], axis=-1)
    lbl = jnp.concatenate([jnp.ones_like(sc1), jnp.zeros_like(sc2)])
    loss = jnp.mean(
        jnp.maximum(logits, 0.0) - logits * lbl + jnp.log1p(jnp.exp(-jnp.abs(logits)))
    )
    return logits, loss


def _run_case(key, N, D, tile_n):
    k_w, k_b, k_c, k_hp, k_hm = jax.random.split(key, 5)
    bound = 1.0 / (D ** 0.5)
    W = jax.random.uniform(k_w, (D, D), jnp.float32, minval=-bound, maxval=bound)
    b = jax.random.uniform(k_b, (D,), jnp.float32, minval=-bound, maxval=bound)
    c = jax.random.normal(k_c, (D,), jnp.float32)
    h_pl = jax.random.normal(k_hp, (N, D), jnp.float32)
    h_mi = jax.random.normal(k_hm, (N, D), jnp.float32)

    logits, loss = discriminator_forward(c, h_pl, h_mi, W, b, tile_n=tile_n)
    jax.block_until_ready((logits, loss))

    ref_logits, ref_loss = _reference(c, h_pl, h_mi, W, b)
    assert jnp.allclose(logits, ref_logits, atol=1e-4, rtol=1e-4)
    assert jnp.allclose(loss, ref_loss, atol=1e-5, rtol=1e-4)


if __name__ == "__main__":
    key = jax.random.PRNGKey(0)
    k1, k2 = jax.random.split(key, 2)

    # Small shape from the module config (num_nodes=8, cl_hdim=32): single tile.
    _run_case(k1, N=8, D=32, tile_n=512)

    # Larger shape exercising multi-tile grid + row padding + masking.
    _run_case(k2, N=384, D=64, tile_n=512)

    print("KERNEL_OK")
</pallas_src>

<mosaic_0001>
module attributes {stable_mosaic.version = 11 : i64} {
  func.func @kernel(%arg0: i32, %arg1: memref<1x32xf32, #tpu.memory_space<vmem>>, %arg2: memref<1x1xf32, #tpu.memory_space<smem>>, %arg3: memref<16x32xf32, #tpu.memory_space<vmem>>, %arg4: memref<1x16xf32, #tpu.memory_space<vmem>>, %arg5: memref<1x16xf32, #tpu.memory_space<vmem>>) attributes {dimension_semantics = [#tpu.dimension_semantics<parallel>], iteration_bounds = array<i64: 1>, scalar_prefetch = 0 : i64, scratch_operands = 0 : i64, tpu.core_type = #tpu.core_type<tc>, window_params = [{pipeline_mode = #tpu.pipeline_mode<synchronous>, transform_indices = @transform_0, window_bounds = array<i64: 1, 32>}, {transform_indices = @transform_1, window_bounds = array<i64: 1, 1>}, {transform_indices = @transform_2, window_bounds = array<i64: 16, 32>}, {transform_indices = @transform_3, window_bounds = array<i64: 1, 16>}, {transform_indices = @transform_4, window_bounds = array<i64: 1, 16>}]} {
    %c0 = arith.constant 0 : index
    %c0_0 = arith.constant 0 : index
    %0 = memref.load %arg2[%c0, %c0_0] : memref<1x1xf32, #tpu.memory_space<smem>>
    %c0_1 = arith.constant 0 : index
    %c0_2 = arith.constant 0 : index
    %1 = vector.load %arg1[%c0_1, %c0_2] : memref<1x32xf32, #tpu.memory_space<vmem>>, vector<1x32xf32>
    %c0_3 = arith.constant 0 : index
    %c0_4 = arith.constant 0 : index
    %2 = vector.load %arg3[%c0_3, %c0_4] : memref<16x32xf32, #tpu.memory_space<vmem>>, vector<16x32xf32>
    %cst = arith.constant dense<0.000000e+00> : vector<1x16xf32>
    %3 = tpu.matmul %1, %2, %cst {dimension_numbers = #tpu.dot_dimension_numbers<[1], [1], [0], [0], [0, 0, 1, 0], [], []>} : vector<1x32xf32>, vector<16x32xf32>, vector<1x16xf32> -> vector<1x16xf32>
    %4 = vector.broadcast %0 : f32 to vector<1x16xf32>
    %5 = arith.addf %3, %4 : vector<1x16xf32>
    %c0_5 = arith.constant 0 : index
    %c0_6 = arith.constant 0 : index
    %6 = vector.load %arg4[%c0_5, %c0_6] : memref<1x16xf32, #tpu.memory_space<vmem>>, vector<1x16xf32>
    tpu.vector_store %arg4[%c0_5, %c0_6], %5 {strides = array<i32>} : memref<1x16xf32, #tpu.memory_space<vmem>>, vector<1x16xf32>,
    %c16_i32 = arith.constant 16 : i32
    %7 = arith.muli %arg0, %c16_i32 : i32
    %8 = tpu.iota {dimensions = array<i32: 1>} : vector<1x16xi32>
    %9 = vector.broadcast %7 : i32 to vector<1x16xi32>
    %10 = arith.addi %9, %8 : vector<1x16xi32>
    %c8_i32 = arith.constant 8 : i32
    %11 = vector.broadcast %c8_i32 : i32 to vector<1x16xi32>
    %12 = arith.cmpi slt, %10, %11 : vector<1x16xi32>
    %cst_7 = arith.constant 1.000000e+00 : f32
    %cst_8 = arith.constant 0.000000e+00 : f32
    %13 = vector.broadcast %cst_7 : f32 to vector<1x16xf32>
    %14 = vector.broadcast %cst_8 : f32 to vector<1x16xf32>
    %15 = arith.select %12, %13, %14 : vector<1x16xi1>, vector<1x16xf32>
    %c16_i32_9 = arith.constant 16 : i32
    %16 = vector.broadcast %c16_i32_9 : i32 to vector<1x16xi32>
    %17 = arith.cmpi slt, %10, %16 : vector<1x16xi32>
    %cst_10 = arith.constant 0.000000e+00 : f32
    %18 = vector.broadcast %cst_10 : f32 to vector<1x16xf32>
    %19 = arith.maximumf %5, %18 : vector<1x16xf32>
    %20 = arith.mulf %5, %15 : vector<1x16xf32>
    %21 = arith.subf %19, %20 : vector<1x16xf32>
    %22 = math.absf %5 : vector<1x16xf32>
    %cst_11 = arith.constant 0.000000e+00 : f32
    %23 = vector.broadcast %cst_11 : f32 to vector<1x16xf32>
    %24 = arith.subf %23, %22 : vector<1x16xf32>
    %25 = math.exp %24 : vector<1x16xf32>
    %26 = math.log1p %25 : vector<1x16xf32>
    %27 = arith.addf %21, %26 : vector<1x16xf32>
    %cst_12 = arith.constant 0.000000e+00 : f32
    %28 = vector.broadcast %cst_12 : f32 to vector<1x16xf32>
    %29 = arith.select %17, %27, %28 : vector<1x16xi1>, vector<1x16xf32>
    %c0_13 = arith.constant 0 : index
    %c0_14 = arith.constant 0 : index
    %30 = vector.load %arg5[%c0_13, %c0_14] : memref<1x16xf32, #tpu.memory_space<vmem>>, vector<1x16xf32>
    tpu.vector_store %arg5[%c0_13, %c0_14], %29 {strides = array<i32>} : memref<1x16xf32, #tpu.memory_space<vmem>>, vector<1x16xf32>,
    return
  }
  func.func @transform_0(%arg0: i32) -> (i32, i32) {
    %c0_i32 = arith.constant 0 : i32
    %c0_i32_0 = arith.constant 0 : i32
    %c0_i32_1 = arith.constant 0 : i32
    return %c0_i32, %c0_i32_0 : i32, i32
  }
  func.func @transform_1(%arg0: i32) -> (i32, i32) {
    %c0_i32 = arith.constant 0 : i32
    %c0_i32_0 = arith.constant 0 : i32
    %c0_i32_1 = arith.constant 0 : i32
    return %c0_i32, %c0_i32_0 : i32, i32
  }
  func.func @transform_2(%arg0: i32) -> (i32, i32) {
    %c0_i32 = arith.constant 0 : i32
    %c0_i32_0 = arith.constant 0 : i32
    return %arg0, %c0_i32 : i32, i32
  }
  func.func @transform_3(%arg0: i32) -> (i32, i32) {
    %c0_i32 = arith.constant 0 : i32
    %c0_i32_0 = arith.constant 0 : i32
    return %c0_i32, %arg0 : i32, i32
  }
  func.func @transform_4(%arg0: i32) -> (i32, i32) {
    %c0_i32 = arith.constant 0 : i32
    %c0_i32_0 = arith.constant 0 : i32
    return %c0_i32, %arg0 : i32, i32
  }
}

</mosaic_0001>

<bundles_post_ra>
// kernel: tpu_custom_call.1
= control target key start
LH: loop header
LB: loop body
LE: loop exit
PB: predicated region body
PF: predicated region fallthrough
CT: control target
= control target key end

     0   :  { %11 = vsyncpa [#allocation4], 0  ;;  %s271_s0 = inlined_call_operand.vmem [shape: f32[1,32], index: 0, kind: input, shape index: {}]   ;;  %s272_s1 = inlined_call_operand.<no memory space> [shape: f32[1,1], index: 1, kind: input, shape index: {}]   ;;  %s273_s2 = inlined_call_operand.hbm [shape: f32[16,32], index: 2, kind: input, shape index: {}]   ;;  %s274_s3 = inlined_call_operand.hbm [shape: f32[1,16], index: 3, kind: output, shape index: {0}]   ;;  %s275_s4 = inlined_call_operand.hbm [shape: f32[1,16], index: 4, kind: output, shape index: {1}]  }
   0x1   :  { %12 = vsyncpa [#allocation5], 0 }
   0x2   :  { %13 = vsyncpa [#allocation8], 0  ;;  %s22_s17 = sshll.u32 %s273_s2, 4  ;;  %s223_s18 = smov [#allocation3]   ;;  %s23_s17 = int_to_ptr.hbm [resolvable:$true] %s22_s17 }
   0x3   :  { %s24_s19 = sshll.u32 %s223_s18, 4  ;;  %s224_s20 = smov 128   ;;  %s25_s19 = int_to_ptr.vmem [resolvable:$true] %s24_s19 }
   0x4   :  { %s225_s21 = smov 8  }
   0x5   :  { %30 = dma.hbm_to_vmem [thread:$0]  %s23_s17, 256, %s25_s19, [#allocation4], %s224_s20, %s224_s20, %s225_s21  }
   0x6   :  { %217 = dma.done.wait [#allocation4], 256  }
   0x7   :  { %218 = vsyncadd [#allocation4], 4294967040  ;;  %vm40_vm0 = vcmask 261120   ;;  %v38_v0 = vld [vmem:[#allocation3 + $0x8] sm:$0xff]  ;;  %v37_v1 = vld [vmem:[#allocation3] sm:$0xff]  ;;  %v39_v3 = vstv %s272_s1  ;;  %s226_s25 = smov [#allocation6]   ;;  %v73_v9 = vlaneseq }
   0x8   :  { %132 = vmatpush.xpose.msk.msra.mxu0 %vm40_vm0, %v38_v0  ;;  %v36_v2 = vld [vmem:[%s271_s0] sm:$0x1]  ;;  %s104_s26 = sshll.u32 %s226_s25, 4  ;;  %s106_s29 = sshll.u32 %s274_s3, 4  ;;  %vm70_vm1 = vcmask 122880   ;;  %v227_v14 = vmov 0.0   ;;  %s105_s26 = int_to_ptr.vmem [resolvable:$true] %s104_s26  ;;  %s107_s29 = int_to_ptr.hbm [resolvable:$true] %s106_s29 }
   0x9   :  { %v74_v10 = vand.u32 127, %v73_v9  ;;  %s228_s0 = smov [#allocation7]   ;;  %s117_s5 = sshll.u32 %s275_s4, 4  ;;  %s118_s5 = int_to_ptr.hbm [resolvable:$true] %s117_s5 }
   0xa   :  { %s115_s1 = sshll.u32 %s228_s0, 4  ;;  %s116_s1 = int_to_ptr.vmem [resolvable:$true] %s115_s1 }
   0xb   :  { %vm77_vm2 = vcmp.lt.s32.totalorder %v74_v10, 8  ;;  %vm79_vm4 = vcmp.lt.s32.totalorder %v74_v10, 16 }
   0xc   :  { %133 = vmatpush.xpose.msk.msra.mxu0 %vm40_vm0, %v37_v1  ;;  %v78_v15 = vsel %vm77_vm2, 1.0, %v227_v14 }
   0xf   :  { %134 = vmatmul.msk.f32.vlgmr.msra.gmra.mxu0 %vm40_vm0, %v36_v2 }
  0x8c   :  { %v67_v4 = vpop.f32.mrf.mxu0 }
  0x8d   :  { %v68_v5 = vadd.f32 %v67_v4, %v39_v3 }
  0x8f   :  { %v83_v6 = vand.u32 2147483647, %v68_v5  ;;  %71 = vst.msk [vmem:[#allocation6] sm:$0x1] %vm70_vm1, %v68_v5  ;;  %v80_v17 = vmax.f32 %v68_v5, 0.0  ;;  %v81_v18 = vmul.f32 %v78_v15, %v68_v5 }
  0x90   :  { %109 = dma.vmem_to_hbm [thread:$0]  %s105_s26, 16, %s107_s29, [#allocation5]  }
  0x91   :  { %v84_v7 = vsub.f32 0.0, %v83_v6  ;;  %v82_v23 = vsub.f32 %v80_v17, %v81_v18 }
  0x93   :  { %v85_v8 = vmul.f32 1.442695, %v84_v7 }
  0x95   :  { %141 = vpow2.f32 %v85_v8 }
  0x9b   :  { %v142_v11 = vpop.eup %141 }
  0x9c   :  { %v87_v12 = vadd.f32 1.0, %v142_v11  ;;  %v90_v13 = vmul.f32 -0.5, %v142_v11  ;;  %v93_v19 = vand.u32 2147483647, %v142_v11 }
  0x9e   :  { %143 = vlog2.f32 %v87_v12  ;;  %v91_v16 = vadd.f32 1.0, %v90_v13  ;;  %vm94_vm3 = vcmp.lt.f32.partialorder %v93_v19, 0.0004427343 }
  0xa0   :  { %v92_v22 = vmul.f32 %v142_v11, %v91_v16 }
  0xa4   :  { %v144_v20 = vpop.eup %143 }
  0xa5   :  { %v89_v21 = vmul.f32 0.6931472, %v144_v20 }
  0xa7   :  { %v95_v24 = vsel %vm94_vm3, %v92_v22, %v89_v21 }
  0xa8   :  { %v96_v25 = vadd.f32 %v95_v24, %v82_v23 }
  0xaa   :  { %v97_v26 = vsel %vm79_vm4, %v96_v25, 0.0 }
  0xab   :  { %98 = vst.msk [vmem:[#allocation7] sm:$0x1] %vm70_vm1, %v97_v26 }
  0xac   :  { %120 = dma.vmem_to_hbm [thread:$0]  %s116_s1, 16, %s118_s5, [#allocation8]  }
  0xad   :  { %219 = dma.done.wait [#allocation5], 16  }
  0xae   :  { %220 = vsyncadd [#allocation5], 4294967280 }
  0xaf   :  { %221 = dma.done.wait [#allocation8], 16  }
  0xb0   :  { %222 = vsyncadd [#allocation8], 4294967280 }
  0xb1   :  { %129 = vsyncpa [#allocation4], 1 }
  0xb2   :  { %130 = vsyncpa [#allocation5], 1 }
  0xb3   :  { %131 = vsyncpa [#allocation8], 1 }

</bundles_post_ra>
